<compile_context>
chip_gen: v5e
topology: v5e:2x2
jax: 0.10.0
libtpu: 0.0.40
codegen_flags: <defaults>
</compile_context>

<pallas_src>
import functools

import jax
import jax.numpy as jnp
from jax.experimental import pallas as pl
from jax.experimental.pallas import tpu as pltpu


# ---------------------------------------------------------------------------
# Kernels
# ---------------------------------------------------------------------------
def _add_pe_kernel(x_ref, pe_ref, o_ref):
    # x_ref: (ts, tb, D); pe_ref: (ts, 1, D) broadcast over the batch (sublane) axis.
    o_ref[...] = (x_ref[...] + pe_ref[...]).astype(o_ref.dtype)


def _add_pe_dropout_prng_kernel(seed_ref, x_ref, pe_ref, o_ref, *,
                                keep_threshold, inv_keep):
    # Hardware-PRNG inverted dropout generated at the final compute shape
    # (no reshapes); a distinct stream per grid tile.
    y = x_ref[...] + pe_ref[...]
    pltpu.prng_seed(seed_ref[0], pl.program_id(0), pl.program_id(1))
    bits = pltpu.bitcast(pltpu.prng_random_bits(y.shape), jnp.uint32)
    keep = bits < jnp.uint32(keep_threshold)
    # Scale survivors in f32 before the single final downcast (exact 1/(1-p)
    # even for bf16 inputs); dropped elements are exactly 0.
    scaled = y.astype(jnp.float32) * jnp.float32(inv_keep)
    o_ref[...] = jnp.where(keep, scaled, 0.0).astype(o_ref.dtype)


def _add_pe_dropout_mask_kernel(x_ref, pe_ref, m_ref, o_ref, *, inv_keep):
    # Fallback path: m_ref is a precomputed int8 keep-mask (0/1).
    y = x_ref[...] + pe_ref[...]
    keep = m_ref[...] != 0
    scaled = y.astype(jnp.float32) * jnp.float32(inv_keep)
    o_ref[...] = jnp.where(keep, scaled, 0.0).astype(o_ref.dtype)


# ---------------------------------------------------------------------------
# Sizing helpers
# ---------------------------------------------------------------------------
def _round_up(n, m):
    return -(-n // m) * m


def _vmem_budget_bytes():
    """Generation-aware VMEM request: ~3/4 of per-core capacity, capped.
    v5e/v6e (128 MiB) -> 96 MiB; v7x (64 MiB/TC) -> 48 MiB; unknown -> 48 MiB."""
    try:
        cap = int(pltpu.get_tpu_info().vmem_capacity_bytes)
    except Exception:
        cap = None
    if not cap:
        cap = 64 * 1024 * 1024
    return max(32 * 1024 * 1024, min(cap * 3 // 4, 96 * 1024 * 1024))


def _pick_tiles(S, B, D, itemsize, target_bytes):
    """Pick (ts, tb) for a ~target_bytes block.  tb is the full batch (or a
    multiple of 8); ts is any size <= S (cdiv grid, no divisor requirement).
    VMEM footprint is accounted with sublane/lane padding of the last two dims."""
    target_bytes = max(int(target_bytes), 64 * 1024)
    pad_d = _round_up(D, 128)
    tb = B
    pad_b = _round_up(B, 8)
    row_bytes = pad_b * pad_d * itemsize          # one (padded) seq row of x in VMEM
    if row_bytes > target_bytes:
        # A single seq row is already too big: tile the batch axis too,
        # keeping tb sublane-aligned (multiple of 8).
        tb_cand = (target_bytes // (pad_d * itemsize)) // 8 * 8
        if 8 <= tb_cand < B:
            tb = tb_cand
            pad_b = tb
            row_bytes = pad_b * pad_d * itemsize
    ts = min(S, max(8, (target_bytes // row_bytes) // 8 * 8))
    # v7x megacore: both grid axes are "parallel"; guarantee >= 2 grid steps
    # whenever S allows so the second TensorCore is not idle (no-op on v5e/v6e).
    if S >= 16 and pl.cdiv(B, tb) < 2 and pl.cdiv(S, ts) < 2:
        ts = (S + 1) // 2
    return ts, tb


def _on_tpu(x):
    """Gate the hardware-PRNG path on the array's actual device platform;
    fall back to the default backend for tracers under jit."""
    try:
        return next(iter(x.devices())).platform == "tpu"
    except Exception:
        return jax.default_backend() == "tpu"


# ---------------------------------------------------------------------------
# Wrapper
# ---------------------------------------------------------------------------
def learnable_positional_encoding(x, pe, *, p=0.1, training=False, seed=0,
                                  rng_key=None, tile_bytes=None):
    """x: (S, B, D).  pe: (max_len, 1, D) learnable parameter.  Returns (S, B, D)."""
    S, B, D = x.shape
    assert pe.shape[0] >= S and pe.shape[1] == 1 and pe.shape[2] == D
    assert 0.0 <= float(p) < 1.0

    apply_dropout = bool(training) and float(p) > 0.0
    use_hw_prng = apply_dropout and _on_tpu(x)

    itemsize = jnp.dtype(x.dtype).itemsize
    budget = _vmem_budget_bytes()
    # Per-stream tile budget: x + out are double-buffered (4 tile-sized buffers)
    # plus the small pe slab; the dropout path additionally materializes a
    # full-tile uint32 random-bits tensor and an f32 intermediate -> smaller tile.
    target = tile_bytes if tile_bytes is not None else budget // (20 if apply_dropout else 12)
    ts, tb = _pick_tiles(S, B, D, itemsize, target)
    grid = (pl.cdiv(S, ts), pl.cdiv(B, tb))

    x_spec = pl.BlockSpec((ts, tb, D), lambda i, j: (i, j, 0))
    pe_spec = pl.BlockSpec((ts, 1, D), lambda i, j: (i, 0, 0))  # constant over j
    o_spec = pl.BlockSpec((ts, tb, D), lambda i, j: (i, j, 0))
    out_shape = jax.ShapeDtypeStruct((S, B, D), x.dtype)

    cparams = pltpu.CompilerParams(
        dimension_semantics=("parallel", "parallel"),
        vmem_limit_bytes=int(budget),
    )
    io_bytes = 2 * S * B * D * itemsize + S * D * jnp.dtype(pe.dtype).itemsize
    cost = pl.CostEstimate(flops=S * B * D * (2 if apply_dropout else 1),
                           transcendentals=0,
                           bytes_accessed=io_bytes)

    if not apply_dropout:
        return pl.pallas_call(
            _add_pe_kernel,
            out_shape=out_shape,
            grid=grid,
            in_specs=[x_spec, pe_spec],
            out_specs=o_spec,
            compiler_params=cparams,
            cost_estimate=cost,
        )(x, pe)

    inv_keep = 1.0 / (1.0 - float(p))

    if use_hw_prng:
        # On-chip hardware PRNG: no extra HBM stream for the dropout mask.
        # Clamp the threshold so (1-p)*2^32 can never overflow uint32 (only
        # biases the keep probability for p < ~1e-9, i.e. negligibly).
        keep_threshold = min(int(round((1.0 - float(p)) * 2.0 ** 32)), 2 ** 32 - 1)
        kernel = functools.partial(_add_pe_dropout_prng_kernel,
                                   keep_threshold=keep_threshold,
                                   inv_keep=inv_keep)
        seed_arr = jnp.asarray([seed], dtype=jnp.int32)
        return pl.pallas_call(
            kernel,
            out_shape=out_shape,
            grid_spec=pltpu.PrefetchScalarGridSpec(
                num_scalar_prefetch=1,                  # seed lands in SMEM
                grid=grid,
                in_specs=[pl.BlockSpec((ts, tb, D), lambda i, j, s: (i, j, 0)),
                          pl.BlockSpec((ts, 1, D), lambda i, j, s: (i, 0, 0))],
                out_specs=pl.BlockSpec((ts, tb, D), lambda i, j, s: (i, j, 0)),
            ),
            compiler_params=cparams,
            cost_estimate=cost,
        )(seed_arr, x, pe)

    # TODO(synk): pltpu.prng_* has no lowering on non-TPU / interpret backends;
    # fall back to a precomputed jax.random int8 keep-mask (different RNG stream,
    # same inverted-dropout semantics) fused into the same add+scale kernel.
    if rng_key is None:
        rng_key = jax.random.PRNGKey(seed)
    keep = jax.random.bernoulli(rng_key, 1.0 - float(p), (S, B, D)).astype(jnp.int8)
    return pl.pallas_call(
        functools.partial(_add_pe_dropout_mask_kernel, inv_keep=inv_keep),
        out_shape=out_shape,
        grid=grid,
        in_specs=[x_spec, pe_spec,
                  pl.BlockSpec((ts, tb, D), lambda i, j: (i, j, 0))],
        out_specs=o_spec,
        compiler_params=cparams,
        cost_estimate=cost,
    )(x, pe, keep)


# ---------------------------------------------------------------------------
# Demo / self-test
# ---------------------------------------------------------------------------
if __name__ == "__main__":
    # Small shapes consistent with the module: (seq_len, batch, d_model)
    seq_len, batch, d_model = 8, 2, 32
    max_len = 64
    dropout_p = 0.1

    key = jax.random.PRNGKey(0)
    kx, kpe, kx2, kdrop = jax.random.split(key, 4)

    x = jax.random.normal(kx, (seq_len, batch, d_model), dtype=jnp.float32)
    # nn.init.uniform_(self.pe, -0.02, 0.02), shape (max_len, 1, d_model)
    pe = jax.random.uniform(kpe, (max_len, 1, d_model), dtype=jnp.float32,
                            minval=-0.02, maxval=0.02)

    # Eval mode: dropout is identity -- check against a pure-JAX reference.
    y_eval = jax.block_until_ready(
        learnable_positional_encoding(x, pe, p=dropout_p, training=False))
    ref = x + pe[:seq_len]
    assert y_eval.shape == (seq_len, batch, d_model)
    assert jnp.allclose(y_eval, ref, atol=1e-6, rtol=1e-6)

    # Misaligned seq length + tiny tile budget: exercises the cdiv grid with a
    # partial edge block (S=20 with ts=8 -> 3 seq tiles, last one masked).
    s2 = 20
    x2 = jax.random.normal(kx2, (s2, batch, d_model), dtype=jnp.float32)
    y2 = jax.block_until_ready(
        learnable_positional_encoding(x2, pe, p=dropout_p, training=False,
                                      tile_bytes=8 * 1024))
    ref2 = x2 + pe[:s2]
    assert y2.shape == (s2, batch, d_model)
    assert jnp.allclose(y2, ref2, atol=1e-6, rtol=1e-6)

    # Training mode: inverted dropout (mask bits differ from torch's RNG stream,
    # semantics match: survivors scaled by 1/(1-p), dropped elements exactly 0).
    y_train = jax.block_until_ready(
        learnable_positional_encoding(x, pe, p=dropout_p, training=True,
                                      seed=1234, rng_key=kdrop))
    assert y_train.shape == (seq_len, batch, d_model)
    scaled_ref = ref * (1.0 / (1.0 - dropout_p))
    ok = jnp.logical_or(jnp.isclose(y_train, scaled_ref, atol=1e-5, rtol=1e-5),
                        y_train == 0.0)
    assert bool(jnp.all(ok))

    print("KERNEL_OK")
</pallas_src>

<mosaic_0001>
module attributes {stable_mosaic.version = 11 : i64} {
  func.func @_add_pe_kernel(%arg0: i32, %arg1: i32, %arg2: memref<8x2x32xf32, #tpu.memory_space<vmem>>, %arg3: memref<8x1x32xf32, #tpu.memory_space<vmem>>, %arg4: memref<8x2x32xf32, #tpu.memory_space<vmem>>) attributes {dimension_semantics = [#tpu.dimension_semantics<parallel>, #tpu.dimension_semantics<parallel>], iteration_bounds = array<i64: 1, 1>, scalar_prefetch = 0 : i64, scratch_operands = 0 : i64, tpu.core_type = #tpu.core_type<tc>, window_params = [{transform_indices = @transform_0, window_bounds = array<i64: 8, 2, 32>}, {transform_indices = @transform_1, window_bounds = array<i64: 8, 1, 32>}, {transform_indices = @transform_2, window_bounds = array<i64: 8, 2, 32>}]} {
    %c0 = arith.constant 0 : index
    %c0_0 = arith.constant 0 : index
    %c0_1 = arith.constant 0 : index
    %0 = vector.load %arg2[%c0, %c0_0, %c0_1] : memref<8x2x32xf32, #tpu.memory_space<vmem>>, vector<8x2x32xf32>
    %c0_2 = arith.constant 0 : index
    %c0_3 = arith.constant 0 : index
    %c0_4 = arith.constant 0 : index
    %1 = vector.load %arg3[%c0_2, %c0_3, %c0_4] : memref<8x1x32xf32, #tpu.memory_space<vmem>>, vector<8x1x32xf32>
    %2 = vector.broadcast %1 : vector<8x1x32xf32> to vector<8x2x32xf32>
    %3 = arith.addf %0, %2 : vector<8x2x32xf32>
    %c0_5 = arith.constant 0 : index
    %c0_6 = arith.constant 0 : index
    %c0_7 = arith.constant 0 : index
    %4 = vector.load %arg4[%c0_5, %c0_6, %c0_7] : memref<8x2x32xf32, #tpu.memory_space<vmem>>, vector<8x2x32xf32>
    tpu.vector_store %arg4[%c0_5, %c0_6, %c0_7], %3 {strides = array<i32>} : memref<8x2x32xf32, #tpu.memory_space<vmem>>, vector<8x2x32xf32>,
    return
  }
  func.func @transform_0(%arg0: i32, %arg1: i32) -> (i32, i32, i32) {
    %c0_i32 = arith.constant 0 : i32
    %c0_i32_0 = arith.constant 0 : i32
    return %arg0, %arg1, %c0_i32 : i32, i32, i32
  }
  func.func @transform_1(%arg0: i32, %arg1: i32) -> (i32, i32, i32) {
    %c0_i32 = arith.constant 0 : i32
    %c0_i32_0 = arith.constant 0 : i32
    %c0_i32_1 = arith.constant 0 : i32
    return %arg0, %c0_i32, %c0_i32_0 : i32, i32, i32
  }
  func.func @transform_2(%arg0: i32, %arg1: i32) -> (i32, i32, i32) {
    %c0_i32 = arith.constant 0 : i32
    %c0_i32_0 = arith.constant 0 : i32
    return %arg0, %arg1, %c0_i32 : i32, i32, i32
  }
}

</mosaic_0001>

<bundles_post_ra>
// kernel: tpu_custom_call.1
= control target key start
LH: loop header
LB: loop body
LE: loop exit
PB: predicated region body
PF: predicated region fallthrough
CT: control target
= control target key end

     0   :  { %vm60_vm0 = vcmask 254976   ;;  %s201_s0 = inlined_call_operand.vmem [shape: f32[8,2,32], index: 0, kind: input, shape index: {}]   ;;  %s202_s1 = inlined_call_operand.vmem [shape: f32[64,1,32], index: 1, kind: input, shape index: {}]   ;;  %s203_s2 = inlined_call_operand.hbm [shape: f32[8,2,32], index: 2, kind: output, shape index: {}]  }
   0x1   :  { %v12_v0 = vld [vmem:[%s201_s0] sm:$0x3]  ;;  %v13_v2 = vld [vmem:[%s201_s0 + $0x2] sm:$0x3]  ;;  %v14_v5 = vld [vmem:[%s201_s0 + $0x4] sm:$0x3] }
   0x2   :  { %v90_v1 = vld [vmem:[%s202_s1] ss:$0 sm:$0xff]  ;;  %v91_v4 = vld [vmem:[%s202_s1 + $0x1] ss:$0 sm:$0xff]  ;;  %v92_v6 = vld [vmem:[%s202_s1 + $0x2] ss:$0 sm:$0xff] }
   0x3   :  { %v52_v3 = vadd.f32 %v90_v1, %v12_v0  ;;  %v15_v7 = vld [vmem:[%s201_s0 + $0x6] sm:$0x3]  ;;  %v53_v8 = vadd.f32 %v91_v4, %v13_v2  ;;  %v93_v9 = vld [vmem:[%s202_s1 + $0x3] ss:$0 sm:$0xff]  ;;  %v16_v10 = vld [vmem:[%s201_s0 + $0x8] sm:$0x3]  ;;  %v54_v11 = vadd.f32 %v92_v6, %v14_v5 }
   0x4   :  { %v94_v12 = vld [vmem:[%s202_s1 + $0x4] ss:$0 sm:$0xff]  ;;  %v17_v13 = vld [vmem:[%s201_s0 + $0xa] sm:$0x3]  ;;  %v55_v14 = vadd.f32 %v93_v9, %v15_v7  ;;  %v95_v15 = vld [vmem:[%s202_s1 + $0x5] ss:$0 sm:$0xff] }
   0x5   :  { %61 = vst.msk [vmem:[#allocation2] sm:$0x3] %vm60_vm0, %v52_v3  ;;  %v56_v16 = vadd.f32 %v94_v12, %v16_v10  ;;  %v18_v17 = vld [vmem:[%s201_s0 + $0xc] sm:$0x3]  ;;  %v57_v18 = vadd.f32 %v95_v15, %v17_v13  ;;  %v96_v19 = vld [vmem:[%s202_s1 + $0x6] ss:$0 sm:$0xff] }
   0x6   :  { %62 = vst.msk [vmem:[#allocation2 + $0x2] sm:$0x3] %vm60_vm0, %v53_v8  ;;  %v19_v20 = vld [vmem:[%s201_s0 + $0xe] sm:$0x3]  ;;  %v97_v21 = vld [vmem:[%s202_s1 + $0x7] ss:$0 sm:$0xff]  ;;  %v58_v22 = vadd.f32 %v96_v19, %v18_v17 }
   0x7   :  { %63 = vst.msk [vmem:[#allocation2 + $0x4] sm:$0x3] %vm60_vm0, %v54_v11 }
   0x8   :  { %64 = vst.msk [vmem:[#allocation2 + $0x6] sm:$0x3] %vm60_vm0, %v55_v14 }
   0x9   :  { %65 = vst.msk [vmem:[#allocation2 + $0x8] sm:$0x3] %vm60_vm0, %v56_v16 }
   0xa   :  { %66 = vst.msk [vmem:[#allocation2 + $0xa] sm:$0x3] %vm60_vm0, %v57_v18 }
   0xb   :  { %7 = vsyncpa [#allocation3], 0  ;;  %s124_s13 = smov [#allocation2]   ;;  %s75_s17 = sshll.u32 %s203_s2, 4  ;;  %v59_v23 = vadd.f32 %v97_v21, %v19_v20  ;;  %67 = vst.msk [vmem:[#allocation2 + $0xc] sm:$0x3] %vm60_vm0, %v58_v22  ;;  %s76_s17 = int_to_ptr.hbm [resolvable:$true] %s75_s17 }
   0xc   :  { %s73_s14 = sshll.u32 %s124_s13, 4  ;;  %s125_s0 = smov 32   ;;  %s74_s14 = int_to_ptr.vmem [resolvable:$true] %s73_s14 }
   0xd   :  { %68 = vst.msk [vmem:[#allocation2 + $0xe] sm:$0x3] %vm60_vm0, %v59_v23  ;;  %s126_s18 = smov 2  }
   0xe   :  { %81 = dma.vmem_to_hbm [thread:$0]  %s74_s14, 256, %s76_s17, [#allocation3], %s125_s0, %s125_s0, %s126_s18  }
   0xf   :  { %122 = dma.done.wait [#allocation3], 256  }
  0x10   :  { %123 = vsyncadd [#allocation3], 4294967040 }
  0x11   :  { %86 = vsyncpa [#allocation3], 1 }

</bundles_post_ra>
